<compile_context>
chip_gen: v5e
topology: v5e:2x2
jax: 0.10.0
libtpu: 0.0.40
codegen_flags: <defaults>
</compile_context>

<pallas_src>
import functools

import jax
import jax.numpy as jnp
from jax import lax
from jax.experimental import pallas as pl
from jax.experimental.pallas import tpu as pltpu


def _obs_norm_kernel(count_ref, obs_ref, stats_ref, out_ref, new_stats_ref,
                     *, epsilon: float, batch_count: float):
    x = obs_ref[...]                                   # (B, TILE_F) f32
    old_mean = stats_ref[0:1, :]                       # (1, TILE_F)
    old_var = stats_ref[1:2, :]                        # (1, TILE_F)
    old_count = count_ref[0]                           # scalar f32 (SMEM)

    # Batch moments over dim 0 (torch.mean / torch.var with unbiased=True).
    batch_mean = jnp.mean(x, axis=0, keepdims=True)    # (1, TILE_F)
    diff = x - batch_mean                              # (B, TILE_F)
    batch_var = jnp.sum(diff * diff, axis=0, keepdims=True) / (batch_count - 1.0)

    # RunningMeanStd.update_from_moments (Chan parallel-variance merge).
    delta = batch_mean - old_mean                      # (1, TILE_F)
    tot_count = old_count + batch_count                # scalar
    inv_tot = 1.0 / tot_count                          # scalar divide (cheap)
    new_mean = old_mean + delta * (batch_count * inv_tot)
    m2 = (old_var * old_count
          + batch_var * batch_count
          + (delta * delta) * (old_count * batch_count * inv_tot))
    new_var = m2 * inv_tot

    # Normalize with the *updated* statistics (PyTorch code path).
    # rsqrt on the (1, TILE_F) stats rides the EUP; the per-element hot path is
    # one subtract + one multiply on the (B, TILE_F) block.
    inv_std = lax.rsqrt(new_var + epsilon)             # (1, TILE_F)
    shift = new_mean - batch_mean                      # (1, TILE_F)
    out_ref[...] = (diff - shift) * inv_std            # == (x - new_mean) * inv_std

    new_stats_ref[0:1, :] = new_mean
    new_stats_ref[1:2, :] = new_var


def _round_up(x: int, m: int) -> int:
    return ((x + m - 1) // m) * m


def _vmem_capacity_bytes() -> int:
    """Per-core VMEM capacity; conservative 64 MiB (v7x) fallback."""
    try:
        cap = getattr(pltpu.get_tpu_info(), "vmem_capacity_bytes", None)
        if cap:
            return int(cap)
    except Exception:
        pass
    return 64 << 20


def _pick_tile_f(B: int, F: int, vmem_budget_bytes: int) -> int:
    """Feature-tile width: multiple of 128, VMEM-budget driven, >=2 tiles if possible."""
    if F <= 128:
        return F                                       # full (tiny) feature extent
    # Double-buffered per-feature-column bytes: 2 bufs x (obs + out + stats in/out) x 4B.
    per_col = 2 * (2 * B + 4) * 4
    max_cols_budget = vmem_budget_bytes // per_col
    max_cols_obs = (8 << 20) // (B * 4)                # obs block <= ~8 MiB
    tile_f = max(128, (min(max_cols_budget, max_cols_obs) // 128) * 128)
    tile_f = min(tile_f, _round_up(F, 128))
    # Give the v7x megacore (2 TensorCores) at least two balanced tiles to shard;
    # the extra grid step is noise on single-core v5e/v6e.
    if tile_f >= F:
        tile_f = _round_up(pl.cdiv(F, 2), 128)
    return tile_f


def obs_normalizer_forward(obs, mean, var, count, epsilon=1e-8):
    """obs: (B, *obs_shape) f32; mean/var: obs_shape f32; count: (1,) f32.

    Returns (normalized_obs, new_mean, new_var, new_count).
    """
    obs = obs.astype(jnp.float32)
    B = obs.shape[0]
    obs_shape = obs.shape[1:]
    F = 1
    for d in obs_shape:
        F *= int(d)

    obs2d = obs.reshape(B, F)
    stats2d = jnp.stack([mean.astype(jnp.float32).reshape(F),
                         var.astype(jnp.float32).reshape(F)], axis=0)   # (2, F)
    count1 = count.astype(jnp.float32).reshape(1)

    vmem_cap = _vmem_capacity_bytes()
    vmem_budget = min(vmem_cap // 2, 48 << 20)
    tile_f = _pick_tile_f(B, F, vmem_budget)
    num_tiles = pl.cdiv(F, tile_f)

    # Double-buffered VMEM footprint for the chosen tile (+ headroom).
    footprint = 2 * (2 * B + 4) * 4 * tile_f
    vmem_limit = int(min(vmem_cap, max(footprint + (4 << 20), 32 << 20)))

    # TODO(synk): for very large B (obs block > ~8 MiB even at tile_f=128), switch
    # to a 2-D grid with a batch 'arbitrary' axis accumulating sum/sumsq in scratch.

    kernel = functools.partial(
        _obs_norm_kernel, epsilon=float(epsilon), batch_count=float(B))

    out, new_stats = pl.pallas_call(
        kernel,
        out_shape=(
            jax.ShapeDtypeStruct((B, F), jnp.float32),
            jax.ShapeDtypeStruct((2, F), jnp.float32),
        ),
        grid_spec=pltpu.PrefetchScalarGridSpec(
            num_scalar_prefetch=1,                     # count -> SMEM
            grid=(num_tiles,),
            in_specs=[
                pl.BlockSpec((B, tile_f), lambda j, cnt: (0, j)),   # obs
                pl.BlockSpec((2, tile_f), lambda j, cnt: (0, j)),   # [mean; var]
            ],
            out_specs=(
                pl.BlockSpec((B, tile_f), lambda j, cnt: (0, j)),   # normalized
                pl.BlockSpec((2, tile_f), lambda j, cnt: (0, j)),   # new [mean; var]
            ),
        ),
        # Operand order is (count, obs, stats): alias stats (input 2) -> new_stats
        # (output 1), matching the module's in-place buffer update.
        input_output_aliases={2: 1},
        compiler_params=pltpu.CompilerParams(
            dimension_semantics=("parallel",),         # megacore on v7x
            vmem_limit_bytes=vmem_limit),
        cost_estimate=pl.CostEstimate(
            flops=int(6 * B * F + 20 * F),
            transcendentals=int(F),
            bytes_accessed=int(2 * B * F * 4 + 4 * F * 4)),
    )(count1, obs2d, stats2d)

    new_count = count1 + jnp.float32(B)                # trivial scalar update

    return (out.reshape((B,) + obs_shape),
            new_stats[0].reshape(obs_shape),
            new_stats[1].reshape(obs_shape),
            new_count)


def _reference(obs, mean, var, count, epsilon=1e-8):
    B = obs.shape[0]
    bm = jnp.mean(obs, axis=0)
    bv = jnp.sum((obs - bm) ** 2, axis=0) / (B - 1)
    delta = bm - mean
    tot = count + B
    nm = mean + delta * B / tot
    m2 = var * count + bv * B + delta ** 2 * count * B / tot
    nv = m2 / tot
    return (obs - nm) / jnp.sqrt(nv + epsilon), nm, nv, tot


if __name__ == "__main__":
    key = jax.random.PRNGKey(0)

    def run_case(obs_space_shape, B, k):
        obs = jax.random.normal(k, (B,) + obs_space_shape, jnp.float32) * 3.0 + 1.5
        # RunningMeanStd __init__: mean = ones, var = ones, count = ones([1]).
        mean0 = jnp.ones(obs_space_shape, jnp.float32)
        var0 = jnp.ones(obs_space_shape, jnp.float32)
        count0 = jnp.ones((1,), jnp.float32)

        out, new_mean, new_var, new_count = obs_normalizer_forward(
            obs, mean0, var0, count0, epsilon=1e-8)
        jax.block_until_ready(out)

        r_out, r_mean, r_var, r_count = _reference(
            obs, mean0, var0, count0.reshape(()), epsilon=1e-8)

        assert jnp.allclose(out, r_out, atol=1e-5, rtol=1e-5)
        assert jnp.allclose(new_mean, r_mean, atol=1e-5, rtol=1e-5)
        assert jnp.allclose(new_var, r_var, atol=1e-5, rtol=1e-5)
        assert jnp.allclose(new_count[0], r_count, atol=1e-5, rtol=1e-5)

    k1, k2 = jax.random.split(key)
    # F = 512 -> two balanced 256-wide tiles (exercises the megacore split).
    run_case((8, 64), 16, k1)
    # F = 300 -> 256-wide tiles with a masked partial tail block (cdiv grid).
    run_case((300,), 16, k2)

    print("KERNEL_OK")
</pallas_src>

<mosaic_0001>
module attributes {stable_mosaic.version = 11 : i64} {
  func.func @_obs_norm_kernel(%arg0: i32, %arg1: memref<1xf32, #tpu.memory_space<smem>>, %arg2: memref<16x256xf32, #tpu.memory_space<vmem>>, %arg3: memref<2x256xf32, #tpu.memory_space<vmem>>, %arg4: memref<16x256xf32, #tpu.memory_space<vmem>>, %arg5: memref<2x256xf32, #tpu.memory_space<vmem>>) attributes {dimension_semantics = [#tpu.dimension_semantics<parallel>], iteration_bounds = array<i64: 2>, scalar_prefetch = 1 : i64, scratch_operands = 0 : i64, tpu.core_type = #tpu.core_type<tc>, window_params = [{transform_indices = @transform_0, window_bounds = array<i64: 16, 256>}, {transform_indices = @transform_1, window_bounds = array<i64: 2, 256>}, {transform_indices = @transform_2, window_bounds = array<i64: 16, 256>}, {transform_indices = @transform_3, window_bounds = array<i64: 2, 256>}]} {
    %c0 = arith.constant 0 : index
    %c0_0 = arith.constant 0 : index
    %0 = vector.load %arg2[%c0, %c0_0] : memref<16x256xf32, #tpu.memory_space<vmem>>, vector<16x256xf32>
    %c0_1 = arith.constant 0 : index
    %c0_2 = arith.constant 0 : index
    %1 = vector.load %arg3[%c0_1, %c0_2] : memref<2x256xf32, #tpu.memory_space<vmem>>, vector<1x256xf32>
    %c1 = arith.constant 1 : index
    %c0_3 = arith.constant 0 : index
    %2 = vector.load %arg3[%c1, %c0_3] : memref<2x256xf32, #tpu.memory_space<vmem>>, vector<1x256xf32>
    %c0_4 = arith.constant 0 : index
    %3 = memref.load %arg1[%c0_4] : memref<1xf32, #tpu.memory_space<smem>>
    %cst = arith.constant dense<0.000000e+00> : vector<256xf32>
    %4 = vector.multi_reduction <add>, %0, %cst [0] : vector<16x256xf32> to vector<256xf32>
    %5 = vector.shape_cast %4 : vector<256xf32> to vector<1x256xf32>
    %cst_5 = arith.constant 1.600000e+01 : f32
    %6 = vector.broadcast %cst_5 : f32 to vector<1x256xf32>
    %7 = arith.divf %5, %6 : vector<1x256xf32>
    %8 = vector.broadcast %7 : vector<1x256xf32> to vector<16x256xf32>
    %9 = arith.subf %0, %8 : vector<16x256xf32>
    %10 = arith.mulf %9, %9 : vector<16x256xf32>
    %cst_6 = arith.constant dense<0.000000e+00> : vector<256xf32>
    %11 = vector.multi_reduction <add>, %10, %cst_6 [0] : vector<16x256xf32> to vector<256xf32>
    %12 = vector.shape_cast %11 : vector<256xf32> to vector<1x256xf32>
    %cst_7 = arith.constant 1.500000e+01 : f32
    %13 = vector.broadcast %cst_7 : f32 to vector<1x256xf32>
    %14 = arith.divf %12, %13 : vector<1x256xf32>
    %15 = arith.subf %7, %1 : vector<1x256xf32>
    %cst_8 = arith.constant 1.600000e+01 : f32
    %16 = arith.addf %3, %cst_8 : f32
    %cst_9 = arith.constant 1.000000e+00 : f32
    %17 = arith.divf %cst_9, %16 : f32
    %cst_10 = arith.constant 1.600000e+01 : f32
    %18 = arith.mulf %cst_10, %17 : f32
    %19 = vector.broadcast %18 : f32 to vector<1x256xf32>
    %20 = arith.mulf %15, %19 : vector<1x256xf32>
    %21 = arith.addf %1, %20 : vector<1x256xf32>
    %22 = vector.broadcast %3 : f32 to vector<1x256xf32>
    %23 = arith.mulf %2, %22 : vector<1x256xf32>
    %cst_11 = arith.constant 1.600000e+01 : f32
    %24 = vector.broadcast %cst_11 : f32 to vector<1x256xf32>
    %25 = arith.mulf %14, %24 : vector<1x256xf32>
    %26 = arith.addf %23, %25 : vector<1x256xf32>
    %27 = arith.mulf %15, %15 : vector<1x256xf32>
    %cst_12 = arith.constant 1.600000e+01 : f32
    %28 = arith.mulf %3, %cst_12 : f32
    %29 = arith.mulf %28, %17 : f32
    %30 = vector.broadcast %29 : f32 to vector<1x256xf32>
    %31 = arith.mulf %27, %30 : vector<1x256xf32>
    %32 = arith.addf %26, %31 : vector<1x256xf32>
    %33 = vector.broadcast %17 : f32 to vector<1x256xf32>
    %34 = arith.mulf %32, %33 : vector<1x256xf32>
    %cst_13 = arith.constant 9.99999993E-9 : f32
    %35 = vector.broadcast %cst_13 : f32 to vector<1x256xf32>
    %36 = arith.addf %34, %35 : vector<1x256xf32>
    %37 = math.rsqrt %36 : vector<1x256xf32>
    %38 = arith.subf %21, %7 : vector<1x256xf32>
    %39 = vector.broadcast %38 : vector<1x256xf32> to vector<16x256xf32>
    %40 = arith.subf %9, %39 : vector<16x256xf32>
    %41 = vector.broadcast %37 : vector<1x256xf32> to vector<16x256xf32>
    %42 = arith.mulf %40, %41 : vector<16x256xf32>
    %c0_14 = arith.constant 0 : index
    %c0_15 = arith.constant 0 : index
    %43 = vector.load %arg4[%c0_14, %c0_15] : memref<16x256xf32, #tpu.memory_space<vmem>>, vector<16x256xf32>
    tpu.vector_store %arg4[%c0_14, %c0_15], %42 {strides = array<i32>} : memref<16x256xf32, #tpu.memory_space<vmem>>, vector<16x256xf32>,
    %c0_16 = arith.constant 0 : index
    %c0_17 = arith.constant 0 : index
    %44 = vector.load %arg5[%c0_16, %c0_17] : memref<2x256xf32, #tpu.memory_space<vmem>>, vector<1x256xf32>
    tpu.vector_store %arg5[%c0_16, %c0_17], %21 {strides = array<i32>} : memref<2x256xf32, #tpu.memory_space<vmem>>, vector<1x256xf32>,
    %c1_18 = arith.constant 1 : index
    %c0_19 = arith.constant 0 : index
    %45 = vector.load %arg5[%c1_18, %c0_19] : memref<2x256xf32, #tpu.memory_space<vmem>>, vector<1x256xf32>
    tpu.vector_store %arg5[%c1_18, %c0_19], %34 {strides = array<i32>} : memref<2x256xf32, #tpu.memory_space<vmem>>, vector<1x256xf32>,
    return
  }
  func.func @transform_0(%arg0: i32, %arg1: memref<1xf32, #tpu.memory_space<smem>>) -> (i32, i32) {
    %c0_i32 = arith.constant 0 : i32
    %c0_i32_0 = arith.constant 0 : i32
    return %c0_i32, %arg0 : i32, i32
  }
  func.func @transform_1(%arg0: i32, %arg1: memref<1xf32, #tpu.memory_space<smem>>) -> (i32, i32) {
    %c0_i32 = arith.constant 0 : i32
    %c0_i32_0 = arith.constant 0 : i32
    return %c0_i32, %arg0 : i32, i32
  }
  func.func @transform_2(%arg0: i32, %arg1: memref<1xf32, #tpu.memory_space<smem>>) -> (i32, i32) {
    %c0_i32 = arith.constant 0 : i32
    %c0_i32_0 = arith.constant 0 : i32
    return %c0_i32, %arg0 : i32, i32
  }
  func.func @transform_3(%arg0: i32, %arg1: memref<1xf32, #tpu.memory_space<smem>>) -> (i32, i32) {
    %c0_i32 = arith.constant 0 : i32
    %c0_i32_0 = arith.constant 0 : i32
    return %c0_i32, %arg0 : i32, i32
  }
}

</mosaic_0001>

<bundles_post_ra>
// kernel: tpu_custom_call.1
= control target key start
LH: loop header
LB: loop body
LE: loop exit
PB: predicated region body
PF: predicated region fallthrough
CT: control target
= control target key end

     0   :  { %s1117_s0 = inlined_call_operand.<no memory space> [shape: f32[1], index: 0, kind: input, shape index: {}]   ;;  %s1118_s1 = inlined_call_operand.hbm [shape: f32[16,512], index: 1, kind: input, shape index: {}]   ;;  %s1119_s2 = inlined_call_operand.hbm [shape: f32[2,512], index: 2, kind: input, shape index: {}, may-alias: {2,4}]   ;;  %s1120_s3 = inlined_call_operand.hbm [shape: f32[16,512], index: 3, kind: output, shape index: {0}]   ;;  %s1121_s4 = inlined_call_operand.hbm [shape: f32[2,512], index: 4, kind: output, shape index: {1}, may-alias: {2,4}]  }
   0x1   :  { %1122 = sst [smem:[#allocation16_spill]] %s1118_s1 }
   0x2   :  { %10 = sst [smem:[#allocation3]] %s1117_s0 }
   0x3   :  { %11 = vsyncpa [#allocation5], 0 }
   0x4   :  { %13 = vsyncpa [#allocation5 + $0x1], 0 }
   0x5   :  { %14 = vsyncpa [#allocation8], 0 }
   0x6   :  { %16 = vsyncpa [#allocation8 + $0x1], 0 }
   0x7   :  { %17 = vsyncpa [#allocation6], 0 }
   0x8   :  { %19 = vsyncpa [#allocation6 + $0x1], 0 }
   0x9   :  { %20 = vsyncpa [#allocation11], 0 }
   0xa   :  { %22 = vsyncpa [#allocation11 + $0x1], 0  ;;  %s883_s17 = smov 0   ;;  %s885_s18 = smov 0  }
   0xb   :  { %s887_s19 = smov 0   ;;  %s889_s20 = smov 0  }
   0xc LB: > { %s904_s0 = sadd.s32 4294967295, %s845_s20   ;;  %s581_s21 = sadd.s32 4294967294, %s845_s20   ;;  %s845_s20 = sphi %s889_s20, %s1133_s20   ;;  %s841_s19 = sphi %s887_s19, %s1132_s19   ;;  %s837_s18 = sphi %s885_s18, %s1131_s18   ;;  %s833_s17 = sphi %s883_s17, %s1130_s17  }
   0xd   : > { %s908_s22 = sadd.s32 1, %s845_s20   ;;  %s35_s23 = sadd.s32 1, %s841_s19 }
   0xe   : > { %s32_s24 = ssub.s32 %s845_s20, %s908_s22  ;;  %p42_p0 = scmp.ne.s32.totalorder %s841_s19, %s837_s18 }
   0xf   : > { %p33_p1 = scmp.eq.s32.totalorder %s32_s24, 0  ;;  %p43_p2 = scmp.eq.s32.totalorder %s845_s20, 0 }
  0x10   : > { %p48_p3 = scmp.ne.s32.totalorder %s837_s18, %s833_s17  ;;  %p49_p4 = scmp.eq.s32.totalorder %s904_s0, 0 }
  0x11   : > { %s920_s25 = scalar_select %p33_p1, %s841_s19, %s35_s23  }
  0x12   : > { %p922_p5 = por %p43_p2, %p42_p0  ;;  %p926_p6 = por %p49_p4, %p48_p3 }
  0x13   : > { %p98_p7 = scmp.eq.s32.totalorder %s904_s0, 1  ;;  %p104_p8 = scmp.eq.s32.totalorder %s581_s21, 1 }
  0x14   : > { %p583_p9 = scmp.ge.s32.totalorder %s845_s20, 2  ;;  %p633_p10 = scmp.lt.s32.totalorder %s845_s20, 2 }
  0x15   : > { %p933_p11 = por %p98_p7, %p42_p0  ;;  %p937_p12 = por %p104_p8, %p48_p3 }
  0x16   : > { %s942_s30 = sand.u32 1, %s841_s19   ;;  %s605_s5 = sshll.u32 %s845_s20, 4 }
  0x17   : > { %s584_s6 = sshll.u32 %s942_s30, 5  ;;  %s1127_s1 = sld [smem:[#allocation16_spill]] }
  0x18   : > { %s154_s11 = scalar_lea.vmem [#allocation4], %s584_s6  ;;  %p951_p13 = pnand %p633_p10, %p922_p5 }
  0x19   : > { %s162_s12 = sshll.u32 %s154_s11, 4  ;;  %p590_p0 = scmp.ge.s32.totalorder %s845_s20, 1  ;;  %s163_s12 = int_to_ptr.vmem [resolvable:$true] %s162_s12 }
  0x1a   : > { %s151_s14 = scalar_lea.sflag [#allocation5], %s942_s30  ;;  %p687_p2 = pneg %p951_p13 }
  0x1d   : > { %s159_s9 = scalar_lea.hbm %s1127_s1, %s605_s5  ;;  %s690_s24 = scalar_lea.hbm %s1127_s1, 64 }
  0x1e   : > { %s160_s10 = sshll.u32 %s159_s9, 4  ;;  %s161_s10 = int_to_ptr.hbm [resolvable:$true] %s160_s10 }
  0x1f   : > { %s683_s15 = sshra.s32 %s161_s10, 4  ;;  %s684_s15 = int_to_ptr.hbm [resolvable:$true] %s683_s15 }
  0x20   : > { %s685_s16 = scalar_lea.hbm %s684_s15, 32  ;;  %p691_p5 = scmp.lt.s32.totalorder %s684_s15, %s1127_s1 }
  0x21   : > { %p686_p1 = scmp.ne.s32.totalorder %s684_s15, %s685_s16  ;;  %p692_p7 = scmp.lt.s32.totalorder %s690_s24, %s685_s16 }
  0x23   : > { %p688_p3 = pnand %p687_p2, %p686_p1  ;;  %p693_p8 = por %p692_p7, %p691_p5 }
  0x25   : > { %p689_p4 = pneg %p688_p3 }
  0x27   : > { %p694_p10 = pnand %p693_p8, %p689_p4 }
  0x29   : > { %697 = shalt.err (!%p694_p10)
}
  0x2a   : > { %s847_s6 = smov 512   ;;  %s848_s7 = smov 256  }
  0x2b   : > { %s849_s8 = smov 16   ;;  %p190_p1 = scmp.lt.s32.totalorder %s845_s20, 3 }
  0x2c   : > { %622 = dma.hbm_to_vmem [thread:$0]  (!%p951_p13), %s161_s10, 512, %s163_s12, %s151_s14, %s847_s6, %s848_s7, %s849_s8  }
  0x2d   : > { %s587_s9 = sshll.u32 %s942_s30, 2  ;;  %s606_s11 = sshll.u32 %s845_s20, 2 }
  0x2e   : > { %p975_p3 = pnand %p590_p0, %p190_p1  ;;  %s181_s23 = scalar_lea.hbm %s1119_s2, %s606_s11 }
  0x2f   : > { %s176_s24 = scalar_lea.vmem [#allocation7], %s587_s9  ;;  %s183_s5 = sshll.u32 %s181_s23, 4  ;;  %s184_s5 = int_to_ptr.hbm [resolvable:$true] %s183_s5 }
  0x30   : > { %s185_s26 = sshll.u32 %s176_s24, 4  ;;  %s173_s1 = scalar_lea.sflag [#allocation8], %s942_s30  ;;  %s186_s26 = int_to_ptr.vmem [resolvable:$true] %s185_s26 }
  0x31   : > { %s713_s10 = sshra.s32 %s184_s5, 4  ;;  %s720_s7 = scalar_lea.hbm %s1119_s2, 8  ;;  %s714_s10 = int_to_ptr.hbm [resolvable:$true] %s713_s10 }
  0x32   : > { %s715_s12 = scalar_lea.hbm %s714_s10, 4  ;;  %p721_p7 = scmp.lt.s32.totalorder %s714_s10, %s1119_s2 }
  0x33   : > { %p716_p4 = scmp.ne.s32.totalorder %s714_s10, %s715_s12  ;;  %p722_p8 = scmp.lt.s32.totalorder %s720_s7, %s715_s12 }
  0x35   : > { %p718_p0 = pnand %p716_p4, %p687_p2  ;;  %p723_p10 = por %p722_p8, %p721_p7 }
  0x37   : > { %p719_p5 = pneg %p718_p0 }
  0x39   : > { %p724_p1 = pnand %p723_p10, %p719_p5 }
  0x3b   : > { %727 = shalt.err (!%p724_p1)
}
  0x3c   : > { %625 = dma.hbm_to_vmem [thread:$0]  (!%p951_p13), %s184_s5, 64, %s186_s26, %s173_s1  }
  0x3d   : > { %194 = sbr.rel (%p975_p3) target bundleno = 191 (0xbf), region = 28  ;;  %s997_s30 = sand.u32 (!%p975_p3), 1, %s837_s18  }
  0x3e   : > { %s591_s9 = sshll.u32 (!%p975_p3), %s997_s30, 5  ;;  %s197_s16 = scalar_lea.sflag (!%p975_p3), [#allocation5], %s997_s30 }
  0x3f   : > { %s200_s21 = scalar_lea.vmem (!%p975_p3), [#allocation4], %s591_s9 }
  0x42   : > { %816 = dma.done.wait (%p926_p6), %s197_s16, 512  }
  0x43   : > { %818 = vsyncadd (%p926_p6), %s197_s16, 4294966784  ;;  %s592_s1 = sshll.u32 %s997_s30, 2  ;;  %s207_s13 = scalar_lea.sflag [#allocation8], %s997_s30 }
  0x44   : > { %s1011_s15 = scalar_lea.vmem [#allocation7], %s592_s1 }
  0x45   : > { %820 = dma.done.wait (%p926_p6), %s207_s13, 64  }
  0x46   : > { %822 = vsyncadd (%p926_p6), %s207_s13, 4294967232  ;;  %s1017_s23 = sld [smem:[#allocation3]]  ;;  %v850_v0 = vmov 16.0   ;;  %v248_v2 = vld [vmem:[%s200_s21] sm:$0xff]  ;;  %v249_v3 = vld [vmem:[%s200_s21 + $0x8] sm:$0xff]  ;;  %v851_v47 = vmov 15.0  }
  0x47   : > { %675 = vrcp.f32 %v850_v0  ;;  %v250_v4 = vld [vmem:[%s200_s21 + $0x10] sm:$0xff]  ;;  %v251_v5 = vld [vmem:[%s200_s21 + $0x18] sm:$0xff]  ;;  %vm341_vm6 = vcmask 1040384   ;;  %s608_s12 = sshll.u32 %s904_s0, 2  ;;  %s243_s8 = scalar_lea.vmem [#allocation10], %s592_s1 }
  0x48   : > { %v256_v6 = vadd.f32 %v250_v4, %v248_v2  ;;  %v263_v9 = vadd.f32 %v251_v5, %v249_v3  ;;  %s450_s7 = scalar_lea.hbm %s1121_s4, %s608_s12  ;;  %s452_s11 = sshll.u32 %s243_s8, 4  ;;  %s453_s11 = int_to_ptr.vmem [resolvable:$true] %s452_s11 }
  0x49   : > { %s454_s16 = sshll.u32 %s450_s7, 4  ;;  %s422_s21 = scalar_lea.sflag [#allocation11], %s997_s30  ;;  %s455_s16 = int_to_ptr.hbm [resolvable:$true] %s454_s16 }
  0x4a   : > { %v257_v10 = vrot.slane %v256_v6, 4  ;;  %v264_v11 = vrot.slane %v263_v9, 4  ;;  %s757_s13 = sshra.s32 %s455_s16, 4  ;;  %s758_s13 = int_to_ptr.hbm [resolvable:$true] %s757_s13 }
  0x4b   : > { %p764_p3 = scmp.lt.s32.totalorder %s758_s13, %s1121_s4 }
  0x4c   : > { %s317_s24 = sadd.f32 16.0, %s1017_s23  ;;  %v258_v13 = vadd.f32 %v257_v10, %v256_v6  ;;  %v265_v14 = vadd.f32 %v264_v11, %v263_v9  ;;  %s357_s27 = smul.f32 16.0, %s1017_s23  ;;  %v595_v10 = vld [vmem:[%s1011_s15 + $0x1] ss:$2 sm:$0x3] }
  0x4d   : > { %v676_v1 = vpop.eup %675 }
  0x4e   : > { %v271_v7 = vmul.f32 16.0, %v676_v1  ;;  %v318_v8 = vstv %s317_s24  ;;  %v259_v15 = vrot.slane %v258_v13, 2  ;;  %v266_v16 = vrot.slane %v265_v14, 2  ;;  %s763_s24 = scalar_lea.hbm %s1121_s4, 8 }
  0x4f   : > { %677 = vrcp.f32 %v318_v8  ;;  %vm324_vm0 = vweird.f32 %v318_v8  ;;  %v328_v21 = vand.u32 2147483647, %v318_v8  ;;  %v330_v22 = vand.u32 2147483648, %v318_v8 }
  0x50   : > { %v272_v12 = vsub.f32 1.0, %v271_v7  ;;  %v267_v20 = vadd.f32 %v266_v16, %v265_v14  ;;  %v260_v24 = vadd.f32 %v259_v15, %v258_v13  ;;  %vm275_vm2 = vweird.f32 %v676_v1 }
  0x51   : > { %v331_v28 = vor.u32 1.1754944e-38, %v330_v22  ;;  %vm329_vm4 = vcmp.eq.f32.partialorder %v328_v21, 8.507059e+37  ;;  %679 = vrcp.f32 %v851_v47  ;;  %v409_v22 = vlaneseq }
  0x52   : > { %v273_v18 = vmul.f32 %v676_v1, %v272_v12  ;;  %v268_v25 = vrot.slane %v267_v20, 1  ;;  %v261_v30 = vrot.slane %v260_v24, 1  ;;  %v345_v12 = vstv %s1017_s23 }
  0x53   : > { %v346_v16 = vmul.f32 %v595_v10, %v345_v12  ;;  %vm411_vm7 = vcmp.lt.s32.totalorder %v409_v22, 256 }
  0x54   : > { %v274_v26 = vadd.f32 %v676_v1, %v273_v18  ;;  %v269_v31 = vadd.f32 %v268_v25, %v267_v20  ;;  %v262_v35 = vadd.f32 %v261_v30, %v260_v24 }
  0x55   : > { %v678_v17 = vpop.eup %677 }
  0x56   : > { %v320_v19 = vmul.f32 %v678_v17, %v318_v8  ;;  %vm325_vm1 = vweird.f32 %v678_v17  ;;  %v276_v32 = vsel %vm275_vm2, %v676_v1, %v274_v26 }
  0x57   : > { %vm326_vm3 = vmor %vm324_vm0, %vm325_vm1  ;;  %v1020_v36 = vmul.f32 %v276_v32, %v269_v31  ;;  %v1022_v37 = vmul.f32 %v276_v32, %v262_v35  ;;  %v680_v50 = vpop.eup %679 }
  0x58   : > { %v321_v23 = vsub.f32 1.0, %v320_v19  ;;  %v302_v53 = vmul.f32 15.0, %v680_v50  ;;  %vm306_vm5 = vweird.f32 %v680_v50 }
  0x59   : > { %v1025_v38 = vsub.f32 %v249_v3, %v1020_v36  ;;  %v1028_v39 = vsub.f32 %v251_v5, %v1020_v36  ;;  %v1031_v40 = vsub.f32 %v248_v2, %v1022_v37  ;;  %v1034_v41 = vsub.f32 %v250_v4, %v1022_v37  ;;  %v252_v2 = vld [vmem:[%s1011_s15] ss:$2 sm:$0x3]  ;;  %s759_s15 = scalar_lea.hbm %s758_s13, 4 }
  0x5a   : > { %v322_v27 = vmul.f32 %v678_v17, %v321_v23  ;;  %v303_v56 = vsub.f32 1.0, %v302_v53  ;;  %v312_v5 = vperm.slane %v252_v2, 1  ;;  %v311_v7 = vperm.slane %v252_v2, 0  ;;  %p760_p6 = scmp.ne.s32.totalorder %s758_s13, %s759_s15  ;;  %p765_p4 = scmp.lt.s32.totalorder %s763_s24, %s759_s15 }
  0x5b   : > { %v284_v42 = vmul.f32 %v1025_v38, %v1025_v38  ;;  %v286_v43 = vmul.f32 %v1028_v39, %v1028_v39  ;;  %v283_v44 = vmul.f32 %v1031_v40, %v1031_v40  ;;  %v285_v45 = vmul.f32 %v1034_v41, %v1034_v41 }
  0x5c   : > { %v323_v29 = vadd.f32 %v678_v17, %v322_v27  ;;  %v304_v59 = vmul.f32 %v680_v50, %v303_v56  ;;  %v316_v9 = vsub.f32 %v1020_v36, %v312_v5  ;;  %v315_v11 = vsub.f32 %v1022_v37, %v311_v7  ;;  %p761_p13 = pnand %p760_p6, %p933_p11  ;;  %p766_p0 = por %p765_p4, %p764_p3 }
  0x5d   : > { %v294_v46 = vadd.f32 %v286_v43, %v284_v42  ;;  %v287_v48 = vadd.f32 %v285_v45, %v283_v44 }
  0x5e   : > { %v327_v33 = vsel %vm326_vm3, %v678_v17, %v323_v29  ;;  %v305_v62 = vadd.f32 %v680_v50, %v304_v59  ;;  %v356_v15 = vmul.f32 %v316_v9, %v316_v9  ;;  %v355_v19 = vmul.f32 %v315_v11, %v315_v11  ;;  %p762_p2 = pneg %p761_p13 }
  0x5f   : > { %v332_v34 = vsel %vm329_vm4, %v331_v28, %v327_v33  ;;  %v295_v49 = vrot.slane %v294_v46, 4  ;;  %v288_v51 = vrot.slane %v287_v48, 4 }
  0x60   : > { %609 = vpush %v332_v34  ;;  %v307_v1 = vsel %vm306_vm5, %v680_v50, %v305_v62  ;;  %p767_p5 = pnand %p766_p0, %p762_p2 }
  0x61   : > { %v296_v52 = vadd.f32 %v295_v49, %v294_v46  ;;  %v289_v54 = vadd.f32 %v288_v51, %v287_v48 }
  0x63   : > { %v297_v55 = vrot.slane %v296_v52, 2  ;;  %v290_v57 = vrot.slane %v289_v54, 2 }
  0x65   : > { %v298_v58 = vadd.f32 %v297_v55, %v296_v52  ;;  %v291_v60 = vadd.f32 %v290_v57, %v289_v54 }
  0x67   : > { %v299_v61 = vrot.slane %v298_v58, 1  ;;  %v292_v63 = vrot.slane %v291_v60, 1 }
  0x69   : > { %v300_v0 = vadd.f32 %v299_v61, %v298_v58  ;;  %v293_v3 = vadd.f32 %v292_v63, %v291_v60 }
  0x6b   : > { %v309_v4 = vmul.f32 %v307_v1, %v300_v0  ;;  %v308_v6 = vmul.f32 %v307_v1, %v293_v3 }
  0x6d   : > { %v348_v8 = vmul.f32 16.0, %v309_v4  ;;  %v347_v13 = vmul.f32 16.0, %v308_v6 }
  0x6f   : > { %v351_v14 = vrot.slane %v348_v8, 7 }
  0x71   : > { %v352_v18 = vsel %vm341_vm6, %v347_v13, %v351_v14 }
  0x72   : > { %v354_v26 = vadd.f32 %v352_v18, %v346_v16 }
  0x91   : > { %s1050_s26 = spop %609 }
  0x92   : > { %s334_s5 = smul.f32 16.0, %s1050_s26  ;;  %v368_v33 = vstv %s1050_s26 }
  0x93   : > { %s358_s10 = smul.f32 %s1050_s26, %s357_s27 }
  0x94   : > { %v335_v17 = vstv %s334_s5 }
  0x95   : > { %v337_v20 = vmul.f32 %v335_v17, %v316_v9  ;;  %v359_v21 = vstv %s358_s10  ;;  %v336_v24 = vmul.f32 %v335_v17, %v315_v11 }
  0x96   : > { %v361_v23 = vmul.f32 %v359_v21, %v356_v15  ;;  %v360_v27 = vmul.f32 %v359_v21, %v355_v19 }
  0x97   : > { %v340_v25 = vrot.slane %v337_v20, 7 }
  0x98   : > { %v364_v28 = vrot.slane %v361_v23, 7 }
  0x99   : > { %v342_v29 = vsel %vm341_vm6, %v336_v24, %v340_v25 }
  0x9a   : > { %v344_v30 = vadd.f32 %v342_v29, %v252_v2  ;;  %v365_v31 = vsel %vm341_vm6, %v360_v27, %v364_v28 }
  0x9b   : > { %v367_v32 = vadd.f32 %v365_v31, %v354_v26 }
  0x9c   : > { %413 = vst.msk [vmem:[%s243_s8] ss:$2 sm:$0x3] %vm411_vm7, %v344_v30 }
  0x9d   : > { %v369_v34 = vmul.f32 %v368_v33, %v367_v32 }
  0x9f   : > { %v370_v35 = vadd.f32 1e-08, %v369_v34  ;;  %596 = vst.msk [vmem:[%s243_s8 + $0x1] ss:$2 sm:$0x3] %vm411_vm7, %v369_v34 }
  0xa0   : > { %770 = shalt.err (!%p767_p5)
}
  0xa1   : > { %616 = dma.vmem_to_hbm [thread:$0]  (%p933_p11), %s453_s11, 64, %s455_s16, %s422_s21   ;;  %681 = vrsqrt.f32 %v370_v35  ;;  %v383_v42 = vrot.slane %v1020_v36, 7  ;;  %vm377_vm9 = vweird.f32 %v370_v35 }
  0xa2   : > { %s607_s5 = sshll.u32 %s904_s0, 4  ;;  %s236_s0 = scalar_lea.vmem [#allocation9], %s591_s9 }
  0xa3   : > { %v384_v44 = vsel %vm341_vm6, %v1022_v37, %v383_v42  ;;  %s433_s14 = scalar_lea.hbm %s1120_s3, %s607_s5  ;;  %s434_s6 = sshll.u32 %s236_s0, 4  ;;  %s435_s6 = int_to_ptr.vmem [resolvable:$true] %s434_s6 }
  0xa4   : > { %v386_v47 = vsub.f32 %v344_v30, %v384_v44  ;;  %s436_s7 = sshll.u32 %s433_s14, 4  ;;  %s417_s8 = scalar_lea.sflag [#allocation6], %s997_s30  ;;  %s437_s7 = int_to_ptr.hbm [resolvable:$true] %s436_s7 }
  0xa5   : > { %s785_s11 = sshra.s32 %s437_s7, 4  ;;  %s791_s13 = scalar_lea.hbm %s1120_s3, 64  ;;  %s786_s11 = int_to_ptr.hbm [resolvable:$true] %s785_s11 }
  0xa6   : > { %v388_v50 = vperm.slane %v386_v47, 0  ;;  %v389_v51 = vperm.slane %v386_v47, 1  ;;  %s787_s16 = scalar_lea.hbm %s786_s11, 32  ;;  %p792_p1 = scmp.lt.s32.totalorder %s786_s11, %s1120_s3 }
  0xa7   : > { %v682_v43 = vpop.eup %681  ;;  %p788_p7 = scmp.ne.s32.totalorder %s786_s11, %s787_s16  ;;  %p793_p6 = scmp.lt.s32.totalorder %s791_s13, %s787_s16 }
  0xa8   : > { %v372_v45 = vmul.f32 %v682_v43, %v370_v35  ;;  %vm378_vm8 = vweird.f32 %v682_v43  ;;  %v392_v37 = vsub.f32 %v1031_v40, %v388_v50  ;;  %v393_v53 = vsub.f32 %v1025_v38, %v389_v51 }
  0xa9   : > { %vm379_vm10 = vmor %vm377_vm9, %vm378_vm8  ;;  %v394_v54 = vsub.f32 %v1034_v41, %v388_v50  ;;  %v395_v57 = vsub.f32 %v1028_v39, %v389_v51  ;;  %p789_p8 = pnand %p788_p7, %p933_p11  ;;  %p794_p13 = por %p793_p6, %p792_p1 }
  0xaa   : > { %v373_v46 = vmul.f32 %v682_v43, %v372_v45 }
  0xab   : > { %p790_p10 = pneg %p789_p8 }
  0xac   : > { %v374_v48 = vmul.f32 0.5, %v373_v46 }
  0xad   : > { %p795_p2 = pnand %p794_p13, %p790_p10 }
  0xae   : > { %v375_v49 = vsub.f32 1.5, %v374_v48 }
  0xb0   : > { %v376_v52 = vmul.f32 %v682_v43, %v375_v49 }
  0xb2   : > { %v380_v36 = vsel %vm379_vm10, %v682_v43, %v376_v52 }
  0xb3   : > { %v397_v55 = vperm.slane %v380_v36, 0  ;;  %v398_v56 = vperm.slane %v380_v36, 1 }
  0xb5   : > { %v401_v58 = vmul.f32 %v397_v55, %v392_v37  ;;  %v402_v59 = vmul.f32 %v398_v56, %v393_v53  ;;  %v403_v60 = vmul.f32 %v397_v55, %v394_v54  ;;  %v404_v61 = vmul.f32 %v398_v56, %v395_v57 }
  0xb7   : > { %405 = vst [vmem:[%s236_s0] sm:$0xff] %v401_v58 }
  0xb8   : > { %406 = vst [vmem:[%s236_s0 + $0x8] sm:$0xff] %v402_v59 }
  0xb9   : > { %407 = vst [vmem:[%s236_s0 + $0x10] sm:$0xff] %v403_v60 }
  0xba   : > { %408 = vst [vmem:[%s236_s0 + $0x18] sm:$0xff] %v404_v61 }
  0xbb   : > { %798 = shalt.err (!%p795_p2)
}
  0xbc   : > { %s852_s30 = smov 256   ;;  %s853_s23 = smov 512  }
  0xbd   : > { %s854_s24 = smov 16  }
  0xbe   : > { %615 = dma.vmem_to_hbm [thread:$0]  (%p933_p11), %s435_s6, 512, %s437_s7, %s417_s8, %s852_s30, %s853_s23, %s854_s24  }
  0xbf PF: > { %s466_s27 = sand.u32 1, %s833_s17   ;;  %p627_p3 = pnand %p583_p9, %p937_p12 }
  0xc0   : > { %s467_s26 = scalar_lea.sflag [#allocation6], %s466_s27 }
  0xc1   : > { %p628_p4 = pneg %p627_p3 }
  0xc3   : > { %824 = dma.done.wait (%p628_p4), %s467_s26, 512  }
  0xc4   : > { %826 = vsyncadd (%p628_p4), %s467_s26, 4294966784  ;;  %s477_s5 = scalar_lea.sflag [#allocation11], %s466_s27 }
  0xc5   : > { %828 = dma.done.wait (%p628_p4), %s477_s5, 64  }
  0xc6   : > { %830 = vsyncadd (%p628_p4), %s477_s5, 4294967232  ;;  %p25_p11 = scmp.ge.s32.totalorder %s908_s22, 4   ;;  %s1130_s17 = smov %s837_s18 }
  0xc7   : > { %s1131_s18 = smov %s841_s19  ;;  %s1132_s19 = smov %s920_s25 }
  0xc8   : > { %s1133_s20 = smov %s908_s22  ;;  %27 = sbr.rel (!%p25_p11) target bundleno = 12 (0xc), region = 105 }
  0xcd   :  { %483 = vsyncpa [#allocation5], 1 }
  0xce   :  { %485 = vsyncpa [#allocation5 + $0x1], 1 }
  0xcf   :  { %486 = vsyncpa [#allocation8], 1 }
  0xd0   :  { %488 = vsyncpa [#allocation8 + $0x1], 1 }
  0xd1   :  { %489 = vsyncpa [#allocation6], 1 }
  0xd2   :  { %491 = vsyncpa [#allocation6 + $0x1], 1 }
  0xd3   :  { %492 = vsyncpa [#allocation11], 1 }
  0xd4   :  { %494 = vsyncpa [#allocation11 + $0x1], 1 }

</bundles_post_ra>
